<compile_context>
chip_gen: v6e
topology: v6e:2x2x1
jax: 0.10.0
libtpu: 0.0.40
codegen_flags: <defaults>
</compile_context>

<pallas_src>
import functools

import jax
import jax.numpy as jnp
from jax.experimental import pallas as pl
from jax.experimental.pallas import tpu as pltpu


# ----------------------------------------------------------------------------
# Batched 3x3 same-padding conv as ONE big matmul (im2col in wrapper)
# ----------------------------------------------------------------------------
def _matmul_bias_kernel(x_ref, w_ref, b_ref, o_ref, *, apply_relu):
    # x_ref: (mb, 9*Cin) bf16, w_ref: (9*Cin, Cout) bf16, b_ref: (1, Cout) f32
    acc = jnp.dot(x_ref[...], w_ref[...], preferred_element_type=jnp.float32)
    acc = acc + b_ref[...]
    if apply_relu:
        acc = jnp.maximum(acc, 0.0)
    o_ref[...] = acc.astype(o_ref.dtype)


def _im2col_3x3(x):
    """x: (N, H, W, Cin) -> (N*H*W, 9*Cin) with zero 'same' padding."""
    N, H, W, Cin = x.shape
    xp = jnp.pad(x, ((0, 0), (1, 1), (1, 1), (0, 0)))
    taps = [xp[:, dy:dy + H, dx:dx + W, :] for dy in range(3) for dx in range(3)]
    return jnp.concatenate(taps, axis=-1).reshape(N * H * W, 9 * Cin)


def conv3x3_as_matmul(x, w, b, *, apply_relu=False):
    """x: (N, H, W, Cin), w: (3,3,Cin,Cout), b: (Cout,) -> (N, H, W, Cout)."""
    N, H, W, Cin = x.shape
    Cout = w.shape[-1]
    x_col = _im2col_3x3(x).astype(jnp.bfloat16)              # (N*H*W, 9*Cin)
    w_flat = w.reshape(9 * Cin, Cout).astype(jnp.bfloat16)   # (9*Cin, Cout)
    M = N * H * W

    # frames-per-block: keep per-step M >= a few hundred rows to amortize
    # per-grid-step overhead, while dividing N exactly.
    max_fb = max(1, 1024 // (H * W))
    fb = 1
    for d in range(1, N + 1):
        if N % d == 0 and d <= max_fb:
            fb = d
    if (fb * H * W) % 8 != 0:
        fb = N
    mb = fb * H * W

    kern = functools.partial(_matmul_bias_kernel, apply_relu=apply_relu)
    out = pl.pallas_call(
        kern,
        out_shape=jax.ShapeDtypeStruct((M, Cout), jnp.float32),
        grid=(M // mb,),
        in_specs=[
            pl.BlockSpec((mb, 9 * Cin), lambda i: (i, 0)),
            pl.BlockSpec((9 * Cin, Cout), lambda i: (0, 0)),
            pl.BlockSpec((1, Cout), lambda i: (0, 0)),
        ],
        out_specs=pl.BlockSpec((mb, Cout), lambda i: (i, 0)),
        compiler_params=pltpu.CompilerParams(
            dimension_semantics=("parallel",),
            vmem_limit_bytes=48 * 1024 * 1024),
    )(x_col, w_flat, b.reshape(1, Cout).astype(jnp.float32))
    return out.reshape(N, H, W, Cout)


# ----------------------------------------------------------------------------
# Fused ConvLSTM recurrence: grid=(T,), h/c carried in VMEM scratch,
# h->gates 3x3 conv (single K=9*hid dot) + gate nonlinearity in one kernel.
# Gate order assumed i/f/o/g.
# ----------------------------------------------------------------------------
def _convlstm_step_kernel(xg_ref, wh_ref, h_out_ref, hpad_ref, c_ref):
    # xg_ref:   (B, 1, H, W, 4*hid) precomputed input->gates (+bias) for step t
    # wh_ref:   (9*hid, 4*hid) bf16 hidden->gates weight
    # h_out_ref:(B, 1, H, W, hid)
    # hpad_ref: VMEM (B, H+2, W+2, hid) f32 (zero border, interior = h_{t-1})
    # c_ref:    VMEM (B*H*W, hid) f32
    B, Hp2, Wp2, hid = hpad_ref.shape
    H, W = Hp2 - 2, Wp2 - 2
    t = pl.program_id(0)

    @pl.when(t == 0)
    def _():
        hpad_ref[...] = jnp.zeros_like(hpad_ref)
        c_ref[...] = jnp.zeros_like(c_ref)

    hp = hpad_ref[...]
    taps = [hp[:, dy:dy + H, dx:dx + W, :] for dy in range(3) for dx in range(3)]
    patches = jnp.concatenate(taps, axis=-1).reshape(B * H * W, 9 * hid)
    hg = jnp.dot(patches.astype(jnp.bfloat16), wh_ref[...],
                 preferred_element_type=jnp.float32)
    gates = xg_ref[...].reshape(B * H * W, 4 * hid) + hg

    i = jax.nn.sigmoid(gates[:, 0 * hid:1 * hid])
    f = jax.nn.sigmoid(gates[:, 1 * hid:2 * hid])
    o = jax.nn.sigmoid(gates[:, 2 * hid:3 * hid])
    g = jnp.tanh(gates[:, 3 * hid:4 * hid])

    c_next = f * c_ref[...] + i * g
    h = o * jnp.tanh(c_next)

    c_ref[...] = c_next
    h_img = h.reshape(B, H, W, hid)
    hpad_ref[:, 1:1 + H, 1:1 + W, :] = h_img
    h_out_ref[...] = h_img.reshape(B, 1, H, W, hid)


def convlstm_direction(xg, wh_flat_bf16, hid, *, reverse):
    """xg: (B, T, H, W, 4*hid) precomputed input->gates (+bias)."""
    B, T, H, W, _ = xg.shape
    if reverse:
        t_idx = lambda t: (0, T - 1 - t, 0, 0, 0)
    else:
        t_idx = lambda t: (0, t, 0, 0, 0)
    return pl.pallas_call(
        _convlstm_step_kernel,
        out_shape=jax.ShapeDtypeStruct((B, T, H, W, hid), jnp.float32),
        grid=(T,),
        in_specs=[
            pl.BlockSpec((B, 1, H, W, 4 * hid), t_idx),
            pl.BlockSpec((9 * hid, 4 * hid), lambda t: (0, 0)),
        ],
        out_specs=pl.BlockSpec((B, 1, H, W, hid), t_idx),
        scratch_shapes=[
            pltpu.VMEM((B, H + 2, W + 2, hid), jnp.float32),
            pltpu.VMEM((B * H * W, hid), jnp.float32),
        ],
        compiler_params=pltpu.CompilerParams(
            dimension_semantics=("arbitrary",),
            vmem_limit_bytes=48 * 1024 * 1024),
    )(xg, wh_flat_bf16)


# ----------------------------------------------------------------------------
# BiConvLSTM (single layer)
# TODO(synk): BiConvLSTM source not provided; standard ConvLSTM cell run
#             forward + backward, combined with a 3x3 conv over concatenated
#             hidden states (assumption).
# ----------------------------------------------------------------------------
def biconvlstm(feats, params):
    B, T, H, W, fd = feats.shape
    hid = params['hidden_dim']

    # One big matmul: input->gates for both directions, all B*T frames.
    wx = jnp.concatenate([params['w_x_fwd'], params['w_x_bwd']], axis=-1)
    bx = jnp.concatenate([params['b_fwd'], params['b_bwd']], axis=-1)
    frames = feats.reshape(B * T, H, W, fd)
    xg_all = conv3x3_as_matmul(frames, wx, bx)               # (B*T, H, W, 8*hid)
    xg_all = xg_all.reshape(B, T, H, W, 8 * hid)
    xg_f = xg_all[..., :4 * hid]
    xg_b = xg_all[..., 4 * hid:]

    whf = params['w_h_fwd'].reshape(9 * hid, 4 * hid).astype(jnp.bfloat16)
    whb = params['w_h_bwd'].reshape(9 * hid, 4 * hid).astype(jnp.bfloat16)
    hf = convlstm_direction(xg_f, whf, hid, reverse=False)   # (B,T,H,W,hid)
    hb = convlstm_direction(xg_b, whb, hid, reverse=True)

    cat = jnp.concatenate([hf, hb], axis=-1).reshape(B * T, H, W, 2 * hid)
    comb = conv3x3_as_matmul(cat, params['w_cat'], params['b_cat'])
    return comb.reshape(B, T, H, W, hid)


# ----------------------------------------------------------------------------
# Fused classification: max over time + global spatial max-pool + linear
# TODO(synk): Classification submodule source not provided; assumed
#             MaxPool2d(in_size) -> flatten -> Linear(in_channels, num_classes).
# ----------------------------------------------------------------------------
def _classify_kernel(x_ref, w_ref, b_ref, o_ref):
    B, T, H, W, hid = x_ref.shape
    pooled = jnp.max(x_ref[...].reshape(B, T * H * W, hid), axis=1)   # (B, hid)
    o_ref[...] = (jnp.dot(pooled.astype(jnp.bfloat16), w_ref[...],
                          preferred_element_type=jnp.float32) + b_ref[...])


def classification(hidden_seq, w, b):
    B, T, H, W, hid = hidden_seq.shape
    ncls = w.shape[-1]
    return pl.pallas_call(
        _classify_kernel,
        out_shape=jax.ShapeDtypeStruct((B, ncls), jnp.float32),
        grid=(1,),
        in_specs=[
            pl.BlockSpec((B, T, H, W, hid), lambda i: (0, 0, 0, 0, 0)),
            pl.BlockSpec((hid, ncls), lambda i: (0, 0)),
            pl.BlockSpec((1, ncls), lambda i: (0, 0)),
        ],
        out_specs=pl.BlockSpec((B, ncls), lambda i: (0, 0)),
        compiler_params=pltpu.CompilerParams(
            dimension_semantics=("arbitrary",)),
    )(hidden_seq, w.astype(jnp.bfloat16), b.reshape(1, ncls).astype(jnp.float32))


# ----------------------------------------------------------------------------
# Parameters (deterministic, synthetic)
# ----------------------------------------------------------------------------
def init_params(key, in_ch, feat_dim, hid, ncls):
    ks = jax.random.split(key, 8)

    def w(k, shape, fan_in):
        return jax.random.normal(k, shape, jnp.float32) / jnp.sqrt(fan_in)

    return {
        'enc_w': w(ks[0], (3, 3, in_ch, feat_dim), 9 * in_ch),
        'enc_b': jnp.zeros((feat_dim,), jnp.float32),
        'w_x_fwd': w(ks[1], (3, 3, feat_dim, 4 * hid), 9 * (feat_dim + hid)),
        'w_h_fwd': w(ks[2], (3, 3, hid, 4 * hid), 9 * (feat_dim + hid)),
        'b_fwd': jnp.zeros((4 * hid,), jnp.float32),
        'w_x_bwd': w(ks[3], (3, 3, feat_dim, 4 * hid), 9 * (feat_dim + hid)),
        'w_h_bwd': w(ks[4], (3, 3, hid, 4 * hid), 9 * (feat_dim + hid)),
        'b_bwd': jnp.zeros((4 * hid,), jnp.float32),
        'w_cat': w(ks[5], (3, 3, 2 * hid, hid), 9 * 2 * hid),
        'b_cat': jnp.zeros((hid,), jnp.float32),
        'cls_w': w(ks[6], (hid, ncls), hid),
        'cls_b': jnp.zeros((ncls,), jnp.float32),
        'hidden_dim': hid,
    }


# ----------------------------------------------------------------------------
# VP forward: ConvEncoder -> BiConvLSTM -> max over time -> Classification
# ----------------------------------------------------------------------------
def vp_forward(clips, params):
    B, T, C, H, W = clips.shape
    x = jnp.transpose(clips, (0, 1, 3, 4, 2)).astype(jnp.float32)  # (B,T,H,W,C)

    # ConvEncoder
    # TODO(synk): real ConvEncoder is a deep pretrained CNN backbone (e.g. VGG)
    # mapping 224x224x3 -> 14x14x512; stand-in is one 3x3 conv + ReLU at the
    # reduced synthetic scale.
    feats = conv3x3_as_matmul(x.reshape(B * T, H, W, C), params['enc_w'],
                              params['enc_b'], apply_relu=True)
    feats = feats.reshape(B, T, H, W, -1)

    # BiConvLSTM
    hidden = biconvlstm(feats, params)                            # (B,T,H,W,hid)

    # .max(dim=1)[0] fused with spatial max-pool + linear head
    logits = classification(hidden, params['cls_w'], params['cls_b'])
    return {'classification': logits}


if __name__ == "__main__":
    key = jax.random.PRNGKey(0)
    k_clip, k_param = jax.random.split(key)

    # small shapes consistent with the module (14x14x512 scaled down to 8x8,
    # channels kept lane-dense at 128)
    B, T, C, H, W = 2, 4, 3, 8, 8
    feat_dim, hid, ncls = 128, 128, 2

    clips = jax.random.normal(k_clip, (B, T, C, H, W), jnp.float32)
    params = init_params(k_param, C, feat_dim, hid, ncls)

    out = vp_forward(clips, params)
    logits = jax.block_until_ready(out['classification'])
    assert logits.shape == (B, ncls) and logits.dtype == jnp.float32
    print("KERNEL_OK")
</pallas_src>

<mosaic_0001>
module attributes {stable_mosaic.version = 11 : i64} {
  func.func @_matmul_bias_kernel(%arg0: i32, %arg1: memref<512x27xbf16, #tpu.memory_space<vmem>>, %arg2: memref<27x128xbf16, #tpu.memory_space<vmem>>, %arg3: memref<1x128xf32, #tpu.memory_space<vmem>>, %arg4: memref<512x128xf32, #tpu.memory_space<vmem>>) attributes {dimension_semantics = [#tpu.dimension_semantics<parallel>], iteration_bounds = array<i64: 1>, scalar_prefetch = 0 : i64, scratch_operands = 0 : i64, tpu.core_type = #tpu.core_type<tc>, window_params = [{transform_indices = @transform_0, window_bounds = array<i64: 512, 27>}, {pipeline_mode = #tpu.pipeline_mode<synchronous>, transform_indices = @transform_1, window_bounds = array<i64: 27, 128>}, {pipeline_mode = #tpu.pipeline_mode<synchronous>, transform_indices = @transform_2, window_bounds = array<i64: 1, 128>}, {transform_indices = @transform_3, window_bounds = array<i64: 512, 128>}]} {
    %c0 = arith.constant 0 : index
    %c0_0 = arith.constant 0 : index
    %0 = vector.load %arg1[%c0, %c0_0] : memref<512x27xbf16, #tpu.memory_space<vmem>>, vector<512x27xbf16>
    %c0_1 = arith.constant 0 : index
    %c0_2 = arith.constant 0 : index
    %1 = vector.load %arg2[%c0_1, %c0_2] : memref<27x128xbf16, #tpu.memory_space<vmem>>, vector<27x128xbf16>
    %cst = arith.constant dense<0.000000e+00> : vector<512x128xf32>
    %2 = tpu.matmul %0, %1, %cst {dimension_numbers = #tpu.dot_dimension_numbers<[1], [0], [0], [1], [0, 0, 1, 1], [], []>} : vector<512x27xbf16>, vector<27x128xbf16>, vector<512x128xf32> -> vector<512x128xf32>
    %c0_3 = arith.constant 0 : index
    %c0_4 = arith.constant 0 : index
    %3 = vector.load %arg3[%c0_3, %c0_4] : memref<1x128xf32, #tpu.memory_space<vmem>>, vector<1x128xf32>
    %4 = vector.broadcast %3 : vector<1x128xf32> to vector<512x128xf32>
    %5 = arith.addf %2, %4 : vector<512x128xf32>
    %cst_5 = arith.constant 0.000000e+00 : f32
    %6 = vector.broadcast %cst_5 : f32 to vector<512x128xf32>
    %7 = arith.maximumf %5, %6 : vector<512x128xf32>
    %c0_6 = arith.constant 0 : index
    %c0_7 = arith.constant 0 : index
    %8 = vector.load %arg4[%c0_6, %c0_7] : memref<512x128xf32, #tpu.memory_space<vmem>>, vector<512x128xf32>
    tpu.vector_store %arg4[%c0_6, %c0_7], %7 {strides = array<i32>} : memref<512x128xf32, #tpu.memory_space<vmem>>, vector<512x128xf32>,
    return
  }
  func.func @transform_0(%arg0: i32) -> (i32, i32) {
    %c0_i32 = arith.constant 0 : i32
    %c0_i32_0 = arith.constant 0 : i32
    return %arg0, %c0_i32 : i32, i32
  }
  func.func @transform_1(%arg0: i32) -> (i32, i32) {
    %c0_i32 = arith.constant 0 : i32
    %c0_i32_0 = arith.constant 0 : i32
    %c0_i32_1 = arith.constant 0 : i32
    return %c0_i32, %c0_i32_0 : i32, i32
  }
  func.func @transform_2(%arg0: i32) -> (i32, i32) {
    %c0_i32 = arith.constant 0 : i32
    %c0_i32_0 = arith.constant 0 : i32
    %c0_i32_1 = arith.constant 0 : i32
    return %c0_i32, %c0_i32_0 : i32, i32
  }
  func.func @transform_3(%arg0: i32) -> (i32, i32) {
    %c0_i32 = arith.constant 0 : i32
    %c0_i32_0 = arith.constant 0 : i32
    return %arg0, %c0_i32 : i32, i32
  }
}

</mosaic_0001>

<bundles_post_ra>
// kernel: tpu_custom_call.1
= control target key start
LH: loop header
LB: loop body
LE: loop exit
PB: predicated region body
PF: predicated region fallthrough
CT: control target
= control target key end

     0   :  { %vm359_vm0 = vcmask 1044480   ;;  %vm360_vm1 = vcmask 1045504   ;;  %v1032_v1 = vmov 65535   ;;  %vm262_vm2 = vcmask 220160   ;;  %s1262_s0 = inlined_call_operand.vmem [shape: bf16[512,27], index: 0, kind: input, shape index: {}]   ;;  %s1263_s1 = inlined_call_operand.vmem [shape: bf16[27,128], index: 1, kind: input, shape index: {}]   ;;  %s1264_s2 = inlined_call_operand.vmem [shape: f32[1,128], index: 2, kind: input, shape index: {}]   ;;  %s1265_s3 = inlined_call_operand.hbm [shape: f32[512,128], index: 3, kind: output, shape index: {}]  }
   0x1   :  { %v976_v0 = vld [vmem:[%s1263_s1 + $0x8] sm:$0x3f]   ;;  %v361_v2 = vsel %vm359_vm0, 4294967295, %v1032_v1  ;;  %v978_v3 = vld [vmem:[%s1262_s0] sm:$0xff]   ;;  %v982_v10 = vld [vmem:[%s1262_s0 + $0x10] sm:$0xff]  }
   0x2   :  { %v362_v4 = vsel %vm360_vm1, %v361_v2, 0  ;;  %v977_v6 = vld [vmem:[%s1263_s1] sm:$0xff]   ;;  %904 = vmatprep.mubr.msk.bf16.mxu0 %vm262_vm2, %v978_v3  ;;  %v980_v8 = vld [vmem:[%s1262_s0 + $0x8] sm:$0xff]   ;;  %v983_v11 = vld [vmem:[%s1262_s0 + $0x90] sm:$0xff]  }
   0x3   :  { %v364_v5 = vand.u32 %v976_v0, %v362_v4  ;;  %v979_v7 = vld [vmem:[%s1262_s0 + $0x80] sm:$0xff]   ;;  %v981_v9 = vld [vmem:[%s1262_s0 + $0x88] sm:$0xff]   ;;  %v984_v12 = vld [vmem:[%s1262_s0 + $0x18] sm:$0xff]  }
   0x4   :  { %936 = vmatprep.mubr.msk.bf16.mxu1 %vm262_vm2, %v979_v7  ;;  %v985_v13 = vld [vmem:[%s1262_s0 + $0x98] sm:$0xff]   ;;  %v986_v14 = vld [vmem:[%s1262_s0 + $0x20] sm:$0xff]   ;;  %v988_v16 = vld [vmem:[%s1262_s0 + $0x28] sm:$0xff]  }
   0x5   :  { %900 = vmatprep.subr.bf16.mxu0 %v364_v5  ;;  %968 = vmatprep.subr.bf16.mxu1 %v364_v5  ;;  %v987_v15 = vld [vmem:[%s1262_s0 + $0xa0] sm:$0xff]   ;;  %v989_v17 = vld [vmem:[%s1262_s0 + $0xa8] sm:$0xff]   ;;  %v990_v18 = vld [vmem:[%s1262_s0 + $0x30] sm:$0xff]  }
   0x6   :  { %901 = vmatpush3.bf16.msra.mxu0 %v364_v5  ;;  %970 = vmatpush3.bf16.msra.mxu1 %v364_v5  ;;  %v991_v19 = vld [vmem:[%s1262_s0 + $0xb0] sm:$0xff]   ;;  %v992_v20 = vld [vmem:[%s1262_s0 + $0x38] sm:$0xff]  }
   0x7   :  { %902 = vmatprep.subr.bf16.mxu0 %v977_v6  ;;  %969 = vmatprep.subr.bf16.mxu1 %v977_v6  ;;  %v993_v21 = vld [vmem:[%s1262_s0 + $0xb8] sm:$0xff]  }
   0xa   :  { %903 = vmatpush3.bf16.msra.mxu0 %v977_v6  ;;  %971 = vmatpush3.bf16.msra.mxu1 %v977_v6 }
   0xd   :  { %905 = vmatmul.mubr.msk.bf16.vlgmr.msra.gmra.mxu0 %vm262_vm2, %v980_v8  ;;  %937 = vmatmul.mubr.msk.bf16.vlgmr.msra.gmra.mxu1 %vm262_vm2, %v981_v9 }
   0xe   :  { %908 = vmatprep.mubr.msk.bf16.mxu0 %vm262_vm2, %v982_v10  ;;  %940 = vmatprep.mubr.msk.bf16.mxu1 %vm262_vm2, %v983_v11 }
  0x15   :  { %909 = vmatmul.mubr.msk.bf16.gmra.mxu0 %vm262_vm2, %v984_v12  ;;  %941 = vmatmul.mubr.msk.bf16.gmra.mxu1 %vm262_vm2, %v985_v13 }
  0x16   :  { %912 = vmatprep.mubr.msk.bf16.mxu0 %vm262_vm2, %v986_v14  ;;  %944 = vmatprep.mubr.msk.bf16.mxu1 %vm262_vm2, %v987_v15 }
  0x1d   :  { %913 = vmatmul.mubr.msk.bf16.gmra.mxu0 %vm262_vm2, %v988_v16  ;;  %945 = vmatmul.mubr.msk.bf16.gmra.mxu1 %vm262_vm2, %v989_v17 }
  0x1e   :  { %916 = vmatprep.mubr.msk.bf16.mxu0 %vm262_vm2, %v990_v18  ;;  %948 = vmatprep.mubr.msk.bf16.mxu1 %vm262_vm2, %v991_v19 }
  0x1f   :  { %8 = vsyncpa [#allocation3], 0  ;;  %v994_v22 = vld [vmem:[%s1262_s0 + $0x40] sm:$0xff]   ;;  %v996_v24 = vld [vmem:[%s1262_s0 + $0x48] sm:$0xff]  }
  0x20   :  { %v995_v23 = vld [vmem:[%s1262_s0 + $0xc0] sm:$0xff]   ;;  %v997_v25 = vld [vmem:[%s1262_s0 + $0xc8] sm:$0xff]   ;;  %v998_v26 = vld [vmem:[%s1262_s0 + $0x50] sm:$0xff]  }
  0x21   :  { %v999_v27 = vld [vmem:[%s1262_s0 + $0xd0] sm:$0xff]   ;;  %v1000_v28 = vld [vmem:[%s1262_s0 + $0x58] sm:$0xff]   ;;  %v1002_v30 = vld [vmem:[%s1262_s0 + $0x60] sm:$0xff]  }
  0x22   :  { %v1001_v29 = vld [vmem:[%s1262_s0 + $0xd8] sm:$0xff]   ;;  %v1003_v31 = vld [vmem:[%s1262_s0 + $0xe0] sm:$0xff]   ;;  %v1004_v32 = vld [vmem:[%s1262_s0 + $0x68] sm:$0xff]  }
  0x23   :  { %v1005_v33 = vld [vmem:[%s1262_s0 + $0xe8] sm:$0xff]   ;;  %v1006_v34 = vld [vmem:[%s1262_s0 + $0x70] sm:$0xff]   ;;  %v1008_v36 = vld [vmem:[%s1262_s0 + $0x78] sm:$0xff]  }
  0x24   :  { %v1007_v35 = vld [vmem:[%s1262_s0 + $0xf0] sm:$0xff]   ;;  %v1009_v37 = vld [vmem:[%s1262_s0 + $0xf8] sm:$0xff]   ;;  %v1193_v38 = vld [vmem:[%s1264_s2] ss:$0 sm:$0xff]  ;;  %s1033_s0 = smov [#allocation2]  }
  0x25   :  { %917 = vmatmul.mubr.msk.bf16.gmra.mxu0 %vm262_vm2, %v992_v20  ;;  %949 = vmatmul.mubr.msk.bf16.gmra.mxu1 %vm262_vm2, %v993_v21  ;;  %s788_s2 = sshll.u32 %s1033_s0, 4  ;;  %s789_s2 = int_to_ptr.vmem [resolvable:$true] %s788_s2 }
  0x26   :  { %920 = vmatprep.mubr.msk.bf16.mxu0 %vm262_vm2, %v994_v22  ;;  %952 = vmatprep.mubr.msk.bf16.mxu1 %vm262_vm2, %v995_v23  ;;  %s1010_s25 = scalar_lea.vmem %s789_s2, 8192  ;;  %p1015_p1 = scmp.lt.s32.totalorder %s789_s2, %s789_s2 }
  0x27   :  { %p1011_p0 = scmp.ne.s32.totalorder %s789_s2, %s1010_s25  ;;  %p1016_p2 = scmp.lt.s32.totalorder %s1010_s25, %s1010_s25 }
  0x29   :  { %p1017_p3 = por %p1016_p2, %p1015_p1 }
  0x2b   :  { %p1018_p4 = pnand %p1017_p3, %p1011_p0 }
  0x2d   :  { %921 = vmatmul.mubr.msk.bf16.gmra.mxu0 %vm262_vm2, %v996_v24  ;;  %953 = vmatmul.mubr.msk.bf16.gmra.mxu1 %vm262_vm2, %v997_v25 }
  0x2e   :  { %924 = vmatprep.mubr.msk.bf16.mxu0 %vm262_vm2, %v998_v26  ;;  %956 = vmatprep.mubr.msk.bf16.mxu1 %vm262_vm2, %v999_v27 }
  0x35   :  { %925 = vmatmul.mubr.msk.bf16.gmra.mxu0 %vm262_vm2, %v1000_v28  ;;  %957 = vmatmul.mubr.msk.bf16.gmra.mxu1 %vm262_vm2, %v1001_v29 }
  0x36   :  { %928 = vmatprep.mubr.msk.bf16.mxu0 %vm262_vm2, %v1002_v30  ;;  %960 = vmatprep.mubr.msk.bf16.mxu1 %vm262_vm2, %v1003_v31 }
  0x3d   :  { %929 = vmatmul.mubr.msk.bf16.gmra.mxu0 %vm262_vm2, %v1004_v32  ;;  %961 = vmatmul.mubr.msk.bf16.gmra.mxu1 %vm262_vm2, %v1005_v33 }
  0x3e   :  { %932 = vmatprep.mubr.msk.bf16.mxu0 %vm262_vm2, %v1006_v34  ;;  %964 = vmatprep.mubr.msk.bf16.mxu1 %vm262_vm2, %v1007_v35 }
  0x45   :  { %933 = vmatmul.mubr.msk.bf16.gmra.mxu0 %vm262_vm2, %v1008_v36  ;;  %965 = vmatmul.mubr.msk.bf16.gmra.mxu1 %vm262_vm2, %v1009_v37 }
  0xcd   :  { %v906_v39 = vpop.f32.mrf.mxu0  ;;  %v938_v40 = vpop.f32.mrf.mxu1 }
  0xce   :  { %v409_v41 = vadd.f32 %v906_v39, %v1193_v38  ;;  %v537_v42 = vadd.f32 %v938_v40, %v1193_v38 }
  0xcf   :  { %v400_v43 = vpop.f32.mrf.mxu0  ;;  %v528_v44 = vpop.f32.mrf.mxu1 }
  0xd0   :  { %v657_v45 = vmax.f32 %v409_v41, 0.0  ;;  %v689_v46 = vmax.f32 %v537_v42, 0.0  ;;  %v401_v47 = vadd.f32 %v1193_v38, %v400_v43  ;;  %v529_v48 = vadd.f32 %v1193_v38, %v528_v44 }
  0xd1   :  { %v907_v49 = vpop.f32.mrf.mxu0  ;;  %v939_v50 = vpop.f32.mrf.mxu1 }
  0xd2   :  { %721 = vst [vmem:[#allocation2 + $0x10] sm:$0xff] %v657_v45  ;;  %753 = vst [vmem:[#allocation2 + $0x110] sm:$0xff] %v689_v46  ;;  %v655_v51 = vmax.f32 %v401_v47, 0.0  ;;  %v687_v52 = vmax.f32 %v529_v48, 0.0  ;;  %v412_v53 = vadd.f32 %v907_v49, %v1193_v38  ;;  %v540_v54 = vadd.f32 %v939_v50, %v1193_v38 }
  0xd3   :  { %v403_v55 = vpop.f32.mrf.mxu0  ;;  %v531_v56 = vpop.f32.mrf.mxu1 }
  0xd4   :  { %719 = vst [vmem:[#allocation2] sm:$0xff] %v655_v51  ;;  %751 = vst [vmem:[#allocation2 + $0x100] sm:$0xff] %v687_v52  ;;  %v658_v57 = vmax.f32 %v412_v53, 0.0  ;;  %v690_v58 = vmax.f32 %v540_v54, 0.0  ;;  %v404_v59 = vadd.f32 %v1193_v38, %v403_v55  ;;  %v532_v60 = vadd.f32 %v1193_v38, %v531_v56 }
  0xd5   :  { %v910_v61 = vpop.f32.mrf.mxu0  ;;  %v942_v62 = vpop.f32.mrf.mxu1 }
  0xd6   :  { %722 = vst [vmem:[#allocation2 + $0x18] sm:$0xff] %v658_v57  ;;  %754 = vst [vmem:[#allocation2 + $0x118] sm:$0xff] %v690_v58  ;;  %v656_v63 = vmax.f32 %v404_v59, 0.0  ;;  %v688_v0 = vmax.f32 %v532_v60, 0.0  ;;  %v425_v1 = vadd.f32 %v910_v61, %v1193_v38  ;;  %v553_v2 = vadd.f32 %v942_v62, %v1193_v38 }
  0xd7   :  { %v416_v3 = vpop.f32.mrf.mxu0  ;;  %v544_v4 = vpop.f32.mrf.mxu1 }
  0xd8   :  { %720 = vst [vmem:[#allocation2 + $0x8] sm:$0xff] %v656_v63  ;;  %752 = vst [vmem:[#allocation2 + $0x108] sm:$0xff] %v688_v0  ;;  %v661_v5 = vmax.f32 %v425_v1, 0.0  ;;  %v693_v6 = vmax.f32 %v553_v2, 0.0  ;;  %v417_v7 = vadd.f32 %v1193_v38, %v416_v3  ;;  %v545_v8 = vadd.f32 %v1193_v38, %v544_v4 }
  0xd9   :  { %v911_v9 = vpop.f32.mrf.mxu0  ;;  %v943_v10 = vpop.f32.mrf.mxu1 }
  0xda   :  { %725 = vst [vmem:[#allocation2 + $0x30] sm:$0xff] %v661_v5  ;;  %757 = vst [vmem:[#allocation2 + $0x130] sm:$0xff] %v693_v6  ;;  %v659_v11 = vmax.f32 %v417_v7, 0.0  ;;  %v691_v12 = vmax.f32 %v545_v8, 0.0  ;;  %v428_v13 = vadd.f32 %v911_v9, %v1193_v38  ;;  %v556_v14 = vadd.f32 %v943_v10, %v1193_v38 }
  0xdb   :  { %v419_v15 = vpop.f32.mrf.mxu0  ;;  %v547_v16 = vpop.f32.mrf.mxu1 }
  0xdc   :  { %723 = vst [vmem:[#allocation2 + $0x20] sm:$0xff] %v659_v11  ;;  %755 = vst [vmem:[#allocation2 + $0x120] sm:$0xff] %v691_v12  ;;  %v662_v17 = vmax.f32 %v428_v13, 0.0  ;;  %v694_v18 = vmax.f32 %v556_v14, 0.0  ;;  %v420_v19 = vadd.f32 %v1193_v38, %v419_v15  ;;  %v548_v20 = vadd.f32 %v1193_v38, %v547_v16 }
  0xdd   :  { %v914_v21 = vpop.f32.mrf.mxu0  ;;  %v946_v22 = vpop.f32.mrf.mxu1 }
  0xde   :  { %726 = vst [vmem:[#allocation2 + $0x38] sm:$0xff] %v662_v17  ;;  %758 = vst [vmem:[#allocation2 + $0x138] sm:$0xff] %v694_v18  ;;  %v660_v23 = vmax.f32 %v420_v19, 0.0  ;;  %v692_v24 = vmax.f32 %v548_v20, 0.0  ;;  %v441_v25 = vadd.f32 %v914_v21, %v1193_v38  ;;  %v569_v26 = vadd.f32 %v946_v22, %v1193_v38 }
  0xdf   :  { %v432_v27 = vpop.f32.mrf.mxu0  ;;  %v560_v28 = vpop.f32.mrf.mxu1 }
  0xe0   :  { %724 = vst [vmem:[#allocation2 + $0x28] sm:$0xff] %v660_v23  ;;  %756 = vst [vmem:[#allocation2 + $0x128] sm:$0xff] %v692_v24  ;;  %v665_v29 = vmax.f32 %v441_v25, 0.0  ;;  %v697_v30 = vmax.f32 %v569_v26, 0.0  ;;  %v433_v31 = vadd.f32 %v1193_v38, %v432_v27  ;;  %v561_v32 = vadd.f32 %v1193_v38, %v560_v28 }
  0xe1   :  { %v915_v33 = vpop.f32.mrf.mxu0  ;;  %v947_v34 = vpop.f32.mrf.mxu1 }
  0xe2   :  { %729 = vst [vmem:[#allocation2 + $0x50] sm:$0xff] %v665_v29  ;;  %761 = vst [vmem:[#allocation2 + $0x150] sm:$0xff] %v697_v30  ;;  %v663_v35 = vmax.f32 %v433_v31, 0.0  ;;  %v695_v36 = vmax.f32 %v561_v32, 0.0  ;;  %v444_v37 = vadd.f32 %v915_v33, %v1193_v38  ;;  %v572_v39 = vadd.f32 %v947_v34, %v1193_v38 }
  0xe3   :  { %v435_v40 = vpop.f32.mrf.mxu0  ;;  %v563_v41 = vpop.f32.mrf.mxu1 }
  0xe4   :  { %727 = vst [vmem:[#allocation2 + $0x40] sm:$0xff] %v663_v35  ;;  %759 = vst [vmem:[#allocation2 + $0x140] sm:$0xff] %v695_v36  ;;  %v666_v42 = vmax.f32 %v444_v37, 0.0  ;;  %v698_v43 = vmax.f32 %v572_v39, 0.0  ;;  %v436_v44 = vadd.f32 %v1193_v38, %v435_v40  ;;  %v564_v45 = vadd.f32 %v1193_v38, %v563_v41 }
  0xe5   :  { %v918_v46 = vpop.f32.mrf.mxu0  ;;  %v950_v47 = vpop.f32.mrf.mxu1 }
  0xe6   :  { %730 = vst [vmem:[#allocation2 + $0x58] sm:$0xff] %v666_v42  ;;  %762 = vst [vmem:[#allocation2 + $0x158] sm:$0xff] %v698_v43  ;;  %v664_v48 = vmax.f32 %v436_v44, 0.0  ;;  %v696_v49 = vmax.f32 %v564_v45, 0.0  ;;  %v457_v50 = vadd.f32 %v918_v46, %v1193_v38  ;;  %v585_v51 = vadd.f32 %v950_v47, %v1193_v38 }
  0xe7   :  { %v448_v52 = vpop.f32.mrf.mxu0  ;;  %v576_v53 = vpop.f32.mrf.mxu1 }
  0xe8   :  { %728 = vst [vmem:[#allocation2 + $0x48] sm:$0xff] %v664_v48  ;;  %760 = vst [vmem:[#allocation2 + $0x148] sm:$0xff] %v696_v49  ;;  %v669_v54 = vmax.f32 %v457_v50, 0.0  ;;  %v701_v55 = vmax.f32 %v585_v51, 0.0  ;;  %v449_v56 = vadd.f32 %v1193_v38, %v448_v52  ;;  %v577_v57 = vadd.f32 %v1193_v38, %v576_v53 }
  0xe9   :  { %v919_v58 = vpop.f32.mrf.mxu0  ;;  %v951_v59 = vpop.f32.mrf.mxu1 }
  0xea   :  { %733 = vst [vmem:[#allocation2 + $0x70] sm:$0xff] %v669_v54  ;;  %765 = vst [vmem:[#allocation2 + $0x170] sm:$0xff] %v701_v55  ;;  %v667_v60 = vmax.f32 %v449_v56, 0.0  ;;  %v699_v61 = vmax.f32 %v577_v57, 0.0  ;;  %v460_v62 = vadd.f32 %v919_v58, %v1193_v38  ;;  %v588_v63 = vadd.f32 %v951_v59, %v1193_v38 }
  0xeb   :  { %v451_v0 = vpop.f32.mrf.mxu0  ;;  %v579_v1 = vpop.f32.mrf.mxu1 }
  0xec   :  { %731 = vst [vmem:[#allocation2 + $0x60] sm:$0xff] %v667_v60  ;;  %763 = vst [vmem:[#allocation2 + $0x160] sm:$0xff] %v699_v61  ;;  %v670_v2 = vmax.f32 %v460_v62, 0.0  ;;  %v702_v3 = vmax.f32 %v588_v63, 0.0  ;;  %v452_v4 = vadd.f32 %v1193_v38, %v451_v0  ;;  %v580_v5 = vadd.f32 %v1193_v38, %v579_v1 }
  0xed   :  { %v922_v6 = vpop.f32.mrf.mxu0  ;;  %v954_v7 = vpop.f32.mrf.mxu1 }
  0xee   :  { %734 = vst [vmem:[#allocation2 + $0x78] sm:$0xff] %v670_v2  ;;  %766 = vst [vmem:[#allocation2 + $0x178] sm:$0xff] %v702_v3  ;;  %v668_v8 = vmax.f32 %v452_v4, 0.0  ;;  %v700_v9 = vmax.f32 %v580_v5, 0.0  ;;  %v473_v10 = vadd.f32 %v922_v6, %v1193_v38  ;;  %v601_v11 = vadd.f32 %v954_v7, %v1193_v38 }
  0xef   :  { %v464_v12 = vpop.f32.mrf.mxu0  ;;  %v592_v13 = vpop.f32.mrf.mxu1 }
  0xf0   :  { %732 = vst [vmem:[#allocation2 + $0x68] sm:$0xff] %v668_v8  ;;  %764 = vst [vmem:[#allocation2 + $0x168] sm:$0xff] %v700_v9  ;;  %v673_v14 = vmax.f32 %v473_v10, 0.0  ;;  %v705_v15 = vmax.f32 %v601_v11, 0.0  ;;  %v465_v16 = vadd.f32 %v1193_v38, %v464_v12  ;;  %v593_v17 = vadd.f32 %v1193_v38, %v592_v13 }
  0xf1   :  { %v923_v18 = vpop.f32.mrf.mxu0  ;;  %v955_v19 = vpop.f32.mrf.mxu1 }
  0xf2   :  { %737 = vst [vmem:[#allocation2 + $0x90] sm:$0xff] %v673_v14  ;;  %769 = vst [vmem:[#allocation2 + $0x190] sm:$0xff] %v705_v15  ;;  %v671_v20 = vmax.f32 %v465_v16, 0.0  ;;  %v703_v21 = vmax.f32 %v593_v17, 0.0  ;;  %v476_v22 = vadd.f32 %v923_v18, %v1193_v38  ;;  %v604_v23 = vadd.f32 %v955_v19, %v1193_v38 }
  0xf3   :  { %v467_v24 = vpop.f32.mrf.mxu0  ;;  %v595_v25 = vpop.f32.mrf.mxu1 }
  0xf4   :  { %735 = vst [vmem:[#allocation2 + $0x80] sm:$0xff] %v671_v20  ;;  %767 = vst [vmem:[#allocation2 + $0x180] sm:$0xff] %v703_v21  ;;  %v674_v26 = vmax.f32 %v476_v22, 0.0  ;;  %v706_v27 = vmax.f32 %v604_v23, 0.0  ;;  %v468_v28 = vadd.f32 %v1193_v38, %v467_v24  ;;  %v596_v29 = vadd.f32 %v1193_v38, %v595_v25 }
  0xf5   :  { %v926_v30 = vpop.f32.mrf.mxu0  ;;  %v958_v31 = vpop.f32.mrf.mxu1 }
  0xf6   :  { %738 = vst [vmem:[#allocation2 + $0x98] sm:$0xff] %v674_v26  ;;  %770 = vst [vmem:[#allocation2 + $0x198] sm:$0xff] %v706_v27  ;;  %v672_v32 = vmax.f32 %v468_v28, 0.0  ;;  %v704_v33 = vmax.f32 %v596_v29, 0.0  ;;  %v489_v34 = vadd.f32 %v926_v30, %v1193_v38  ;;  %v617_v35 = vadd.f32 %v958_v31, %v1193_v38 }
  0xf7   :  { %v480_v36 = vpop.f32.mrf.mxu0  ;;  %v608_v37 = vpop.f32.mrf.mxu1 }
  0xf8   :  { %736 = vst [vmem:[#allocation2 + $0x88] sm:$0xff] %v672_v32  ;;  %768 = vst [vmem:[#allocation2 + $0x188] sm:$0xff] %v704_v33  ;;  %v677_v39 = vmax.f32 %v489_v34, 0.0  ;;  %v709_v40 = vmax.f32 %v617_v35, 0.0  ;;  %v481_v41 = vadd.f32 %v1193_v38, %v480_v36  ;;  %v609_v42 = vadd.f32 %v1193_v38, %v608_v37 }
  0xf9   :  { %v927_v43 = vpop.f32.mrf.mxu0  ;;  %v959_v44 = vpop.f32.mrf.mxu1 }
  0xfa   :  { %741 = vst [vmem:[#allocation2 + $0xb0] sm:$0xff] %v677_v39  ;;  %773 = vst [vmem:[#allocation2 + $0x1b0] sm:$0xff] %v709_v40  ;;  %v675_v45 = vmax.f32 %v481_v41, 0.0  ;;  %v707_v46 = vmax.f32 %v609_v42, 0.0  ;;  %v492_v47 = vadd.f32 %v927_v43, %v1193_v38  ;;  %v620_v48 = vadd.f32 %v959_v44, %v1193_v38 }
  0xfb   :  { %v483_v49 = vpop.f32.mrf.mxu0  ;;  %v611_v50 = vpop.f32.mrf.mxu1 }
  0xfc   :  { %739 = vst [vmem:[#allocation2 + $0xa0] sm:$0xff] %v675_v45  ;;  %771 = vst [vmem:[#allocation2 + $0x1a0] sm:$0xff] %v707_v46  ;;  %v678_v51 = vmax.f32 %v492_v47, 0.0  ;;  %v710_v52 = vmax.f32 %v620_v48, 0.0  ;;  %v484_v53 = vadd.f32 %v1193_v38, %v483_v49  ;;  %v612_v54 = vadd.f32 %v1193_v38, %v611_v50 }
  0xfd   :  { %v930_v55 = vpop.f32.mrf.mxu0  ;;  %v962_v56 = vpop.f32.mrf.mxu1 }
  0xfe   :  { %742 = vst [vmem:[#allocation2 + $0xb8] sm:$0xff] %v678_v51  ;;  %774 = vst [vmem:[#allocation2 + $0x1b8] sm:$0xff] %v710_v52  ;;  %v676_v57 = vmax.f32 %v484_v53, 0.0  ;;  %v708_v58 = vmax.f32 %v612_v54, 0.0  ;;  %v505_v59 = vadd.f32 %v930_v55, %v1193_v38  ;;  %v633_v60 = vadd.f32 %v962_v56, %v1193_v38 }
  0xff   :  { %v496_v61 = vpop.f32.mrf.mxu0  ;;  %v624_v62 = vpop.f32.mrf.mxu1 }
 0x100   :  { %740 = vst [vmem:[#allocation2 + $0xa8] sm:$0xff] %v676_v57  ;;  %772 = vst [vmem:[#allocation2 + $0x1a8] sm:$0xff] %v708_v58  ;;  %v681_v63 = vmax.f32 %v505_v59, 0.0  ;;  %v713_v0 = vmax.f32 %v633_v60, 0.0  ;;  %v497_v1 = vadd.f32 %v1193_v38, %v496_v61  ;;  %v625_v2 = vadd.f32 %v1193_v38, %v624_v62 }
 0x101   :  { %v931_v3 = vpop.f32.mrf.mxu0  ;;  %v963_v4 = vpop.f32.mrf.mxu1 }
 0x102   :  { %745 = vst [vmem:[#allocation2 + $0xd0] sm:$0xff] %v681_v63  ;;  %777 = vst [vmem:[#allocation2 + $0x1d0] sm:$0xff] %v713_v0  ;;  %v679_v5 = vmax.f32 %v497_v1, 0.0  ;;  %v711_v6 = vmax.f32 %v625_v2, 0.0  ;;  %v508_v7 = vadd.f32 %v931_v3, %v1193_v38  ;;  %v636_v8 = vadd.f32 %v963_v4, %v1193_v38 }
 0x103   :  { %v499_v9 = vpop.f32.mrf.mxu0  ;;  %v627_v10 = vpop.f32.mrf.mxu1 }
 0x104   :  { %743 = vst [vmem:[#allocation2 + $0xc0] sm:$0xff] %v679_v5  ;;  %775 = vst [vmem:[#allocation2 + $0x1c0] sm:$0xff] %v711_v6  ;;  %v682_v11 = vmax.f32 %v508_v7, 0.0  ;;  %v714_v12 = vmax.f32 %v636_v8, 0.0  ;;  %v500_v13 = vadd.f32 %v1193_v38, %v499_v9  ;;  %v628_v14 = vadd.f32 %v1193_v38, %v627_v10 }
 0x105   :  { %v934_v15 = vpop.f32.mrf.mxu0  ;;  %v966_v16 = vpop.f32.mrf.mxu1 }
 0x106   :  { %746 = vst [vmem:[#allocation2 + $0xd8] sm:$0xff] %v682_v11  ;;  %778 = vst [vmem:[#allocation2 + $0x1d8] sm:$0xff] %v714_v12  ;;  %v680_v17 = vmax.f32 %v500_v13, 0.0  ;;  %v712_v18 = vmax.f32 %v628_v14, 0.0  ;;  %v521_v19 = vadd.f32 %v934_v15, %v1193_v38  ;;  %v649_v20 = vadd.f32 %v966_v16, %v1193_v38 }
 0x107   :  { %v512_v21 = vpop.f32.mrf.mxu0  ;;  %v640_v22 = vpop.f32.mrf.mxu1 }
 0x108   :  { %744 = vst [vmem:[#allocation2 + $0xc8] sm:$0xff] %v680_v17  ;;  %776 = vst [vmem:[#allocation2 + $0x1c8] sm:$0xff] %v712_v18  ;;  %v685_v23 = vmax.f32 %v521_v19, 0.0  ;;  %v717_v24 = vmax.f32 %v649_v20, 0.0  ;;  %v513_v25 = vadd.f32 %v1193_v38, %v512_v21  ;;  %v641_v26 = vadd.f32 %v1193_v38, %v640_v22 }
 0x109   :  { %v935_v27 = vpop.f32.mrf.mxu0  ;;  %v967_v28 = vpop.f32.mrf.mxu1 }
 0x10a   :  { %749 = vst [vmem:[#allocation2 + $0xf0] sm:$0xff] %v685_v23  ;;  %781 = vst [vmem:[#allocation2 + $0x1f0] sm:$0xff] %v717_v24  ;;  %v683_v29 = vmax.f32 %v513_v25, 0.0  ;;  %v715_v30 = vmax.f32 %v641_v26, 0.0  ;;  %v524_v31 = vadd.f32 %v935_v27, %v1193_v38  ;;  %v652_v32 = vadd.f32 %v967_v28, %v1193_v38 }
 0x10b   :  { %v515_v33 = vpop.f32.mrf.mxu0  ;;  %v643_v34 = vpop.f32.mrf.mxu1 }
 0x10c   :  { %747 = vst [vmem:[#allocation2 + $0xe0] sm:$0xff] %v683_v29  ;;  %779 = vst [vmem:[#allocation2 + $0x1e0] sm:$0xff] %v715_v30  ;;  %v686_v35 = vmax.f32 %v524_v31, 0.0  ;;  %v718_v36 = vmax.f32 %v652_v32, 0.0  ;;  %v516_v37 = vadd.f32 %v1193_v38, %v515_v33  ;;  %v644_v39 = vadd.f32 %v1193_v38, %v643_v34 }
 0x10e   :  { %750 = vst [vmem:[#allocation2 + $0xf8] sm:$0xff] %v686_v35  ;;  %782 = vst [vmem:[#allocation2 + $0x1f8] sm:$0xff] %v718_v36  ;;  %v684_v40 = vmax.f32 %v516_v37, 0.0  ;;  %v716_v41 = vmax.f32 %v644_v39, 0.0 }
 0x110   :  { %748 = vst [vmem:[#allocation2 + $0xe8] sm:$0xff] %v684_v40  ;;  %780 = vst [vmem:[#allocation2 + $0x1e8] sm:$0xff] %v716_v41 }
 0x111   :  { %1021 = shalt.err (!%p1018_p4)
}
 0x112   :  { %s1034_s26 = smov 128   ;;  %s1035_s27 = smov 8  }
 0x113   :  { %794 = dma.vmem_to_hbm [thread:$0]  %s789_s2, 8192, %s1265_s3, [#allocation3], %s1034_s26, %s1034_s26, %s1035_s27  }
 0x114   :  { %1030 = dma.done.wait [#allocation3], 8192  }
 0x115   :  { %1031 = vsyncadd [#allocation3], 4294959104 }
 0x116   :  { %798 = vsyncpa [#allocation3], 1 }

</bundles_post_ra>
